<compile_context>
chip_gen: v7x
topology: tpu7x:2x2x1
jax: 0.10.0
libtpu: 0.0.40
codegen_flags: <defaults>
</compile_context>

<pallas_src>
import functools

import numpy as np
import jax
import jax.numpy as jnp
from jax import lax
from jax.experimental import pallas as pl
from jax.experimental.pallas import tpu as pltpu

HIDDEN = 64  # MLPBase default hidden_size


# ----------------------------------------------------------------------------
# Deterministic parameter initialization (mirrors the PyTorch init_ helpers:
# orthogonal weights with the given gain, zero biases), plus fused packing.
# ----------------------------------------------------------------------------
def _orthogonal(rng, out_dim, in_dim, gain):
    a = rng.standard_normal((out_dim, in_dim)).astype(np.float32)
    flat = a if out_dim >= in_dim else a.T
    q, r = np.linalg.qr(flat)
    q = q * np.sign(np.diag(r))  # make the decomposition unique / match torch
    if out_dim < in_dim:
        q = q.T
    return (gain * q[:out_dim, :in_dim]).astype(np.float32)


def make_params(num_inputs, hidden, num_actions, seed=0):
    """Returns (fused kernel params, raw per-layer params for reference)."""
    rng = np.random.default_rng(seed)
    g = np.sqrt(2.0)  # gain for actor / critic hidden layers in MLPBase

    def lin(out_d, in_d, gain):
        return _orthogonal(rng, out_d, in_d, gain), np.zeros((out_d,), np.float32)

    wa1, ba1 = lin(hidden, num_inputs, g)       # actor layer 1   (torch (out,in))
    wa2, ba2 = lin(hidden, hidden, g)           # actor layer 2
    wc1, bc1 = lin(hidden, num_inputs, g)       # critic layer 1
    wc2, bc2 = lin(hidden, hidden, g)           # critic layer 2
    wv, bv = lin(1, hidden, 1.0)                # critic_linear
    wd, bd = lin(num_actions, hidden, 0.01)     # Categorical linear head

    two_h = 2 * hidden
    assert num_actions < two_h - 1, "num_actions must fit left of the value column"
    assert hidden + 4 <= two_h
    assert num_actions <= 256, "action index must be exactly representable in bf16"

    # layer 1: [wa1 | wc1], stored (in_features, out_features)
    w1 = np.concatenate([wa1.T, wc1.T], axis=1)                 # (num_inputs, 2H)
    b1 = np.concatenate([ba1, bc1])                             # (2H,)
    # layer 2: block-diagonal so [ha | hc] stays side by side
    w2 = np.zeros((two_h, two_h), np.float32)
    w2[:hidden, :hidden] = wa2.T
    w2[hidden:, hidden:] = wc2.T
    b2 = np.concatenate([ba2, bc2])
    # heads: logits from the actor half, value from the critic half, zero pad
    wh = np.zeros((two_h, two_h), np.float32)
    wh[:hidden, :num_actions] = wd.T
    wh[hidden:, two_h - 1] = wv[0, :]
    bh = np.zeros((two_h,), np.float32)
    bh[:num_actions] = bd
    bh[two_h - 1] = bv[0]

    params = {
        "w1": jnp.asarray(w1, jnp.bfloat16),
        "w2": jnp.asarray(w2, jnp.bfloat16),
        "wh": jnp.asarray(wh, jnp.bfloat16),
        "b": jnp.asarray(np.stack([b1, b2, bh]), jnp.float32),  # (3, 2H), f32
    }
    raw = dict(wa1=wa1, ba1=ba1, wa2=wa2, ba2=ba2, wc1=wc1, bc1=bc1,
               wc2=wc2, bc2=bc2, wv=wv, bv=bv, wd=wd, bd=bd)
    return params, raw


# ----------------------------------------------------------------------------
# Fused Pallas kernel: MLPBase forward + value head + Categorical glue.
# ----------------------------------------------------------------------------
def policy_fused_kernel(x_ref, w1_ref, w2_ref, wh_ref, b_ref, out_ref, *,
                        hidden, num_actions):
    two_h = 2 * hidden
    x = x_ref[...]                                   # already bf16 (wrapper cast)
    b1 = b_ref[0:1, :]                               # (1, 2H) f32
    b2 = b_ref[1:2, :]
    bh = b_ref[2:3, :]

    # layer 1 + layer 2: [ha | hc] kept lane-adjacent, tanh/bias in f32
    h1 = jnp.tanh(jnp.dot(x, w1_ref[...],
                          preferred_element_type=jnp.float32) + b1)
    h2 = jnp.tanh(jnp.dot(h1.astype(jnp.bfloat16), w2_ref[...],
                          preferred_element_type=jnp.float32) + b2)
    # fused heads: cols 0:A = logits (from actor half), col 2H-1 = value
    heads = jnp.dot(h2.astype(jnp.bfloat16), wh_ref[...],
                    preferred_element_type=jnp.float32) + bh

    # single-row lane iota; broadcasting does the rest (no (bt, 2H) iota temp)
    lane_i = lax.broadcasted_iota(jnp.int32, (1, two_h), 1)     # (1, 2H)
    lane_f = lane_i.astype(jnp.float32)
    valid = lane_i < num_actions                                # (1, 2H) bool

    neg = jnp.float32(-1e30)
    logits = jnp.where(valid, heads, neg)                       # (bt, 2H)

    # masked softmax statistics (no full-width log_p / probs temps)
    m = jnp.max(logits, axis=-1, keepdims=True)                 # (bt, 1)
    z = logits - m
    e = jnp.where(valid, jnp.exp(z), 0.0)
    s = jnp.sum(e, axis=-1, keepdims=True)
    log_s = jnp.log(s)

    # deterministic action = first argmax lane of the logits
    action = jnp.min(jnp.where(logits >= m, lane_f, jnp.float32(two_h)),
                     axis=-1, keepdims=True)                    # (bt, 1) f32
    # log-prob of the argmax action: log_p[a*] = (m - m) - log(s) = -log(s)
    alp = -log_s
    # entropy = log(s) - sum(e * (logits - m)) / s
    ez = jnp.sum(e * z, axis=-1, keepdims=True)
    ent = log_s - ez * pl.reciprocal(s, approx=True)

    value = heads[:, two_h - 1:two_h]                           # (bt, 1)

    # assemble the slab in registers, then ONE unmasked full-width store
    slab = jnp.where(lane_i < hidden, h2, 0.0)                  # actor features
    slab = jnp.where(lane_i == hidden, value, slab)
    slab = jnp.where(lane_i == hidden + 1, action, slab)
    slab = jnp.where(lane_i == hidden + 2, alp, slab)
    slab = jnp.where(lane_i == hidden + 3, ent, slab)
    out_ref[...] = slab.astype(out_ref.dtype)


def _round_up(x, m):
    return (x + m - 1) // m * m


def _pick_bt(b):
    """Batch tile: multiple of 16 (bf16 sublane packing), capped at 256 to keep
    vreg pressure low, and split so grids with b > 16 have >= 2 steps (v7x)."""
    if b <= 16:
        return 16
    half = -(-b // 2)
    return min(256, _round_up(half, 16))


def policy_fused_forward(x, params, num_actions):
    """Returns the (B, 2H) bf16 result slab from the fused Pallas kernel."""
    b, num_inputs = x.shape
    two_h = params["w2"].shape[0]
    hidden = two_h // 2

    bt = _pick_bt(b)
    bp = _round_up(b, bt)
    x = x.astype(jnp.bfloat16)                 # half-width activation DMA
    if bp != b:
        x = jnp.pad(x, ((0, bp - b), (0, 0)))

    kernel = functools.partial(policy_fused_kernel, hidden=hidden,
                               num_actions=num_actions)
    slab = pl.pallas_call(
        kernel,
        grid=(bp // bt,),
        in_specs=[
            pl.BlockSpec((bt, num_inputs), lambda i: (i, 0)),     # activations
            pl.BlockSpec((num_inputs, two_h), lambda i: (0, 0)),  # fused W1
            pl.BlockSpec((two_h, two_h), lambda i: (0, 0)),       # fused W2
            pl.BlockSpec((two_h, two_h), lambda i: (0, 0)),       # fused heads
            pl.BlockSpec((3, two_h), lambda i: (0, 0)),           # packed biases
        ],
        out_specs=pl.BlockSpec((bt, two_h), lambda i: (i, 0)),
        out_shape=jax.ShapeDtypeStruct((bp, two_h), jnp.bfloat16),
        compiler_params=pltpu.CompilerParams(
            dimension_semantics=("parallel",)),  # batch axis splits across TCs (v7x)
    )(x, params["w1"], params["w2"], params["wh"], params["b"])
    return slab[:b]


# ----------------------------------------------------------------------------
# Policy.act (deterministic) — matches the PyTorch return signature.
# ----------------------------------------------------------------------------
@functools.partial(jax.jit, static_argnames=("num_actions",))
def policy_act(inputs, rnn_hxs, masks, params, *, num_actions):
    # Non-recurrent MLPBase: rnn_hxs passes through untouched, masks unused.
    # TODO(synk): the recurrent GRU branch and stochastic dist.sample() are not
    # implemented (non-recurrent base, deterministic action only).
    del masks
    slab = policy_fused_forward(inputs, params, num_actions)
    h = params["w2"].shape[0] // 2
    value = slab[:, h:h + 1].astype(jnp.float32)
    action = slab[:, h + 1:h + 2].astype(jnp.int32)
    action_log_probs = slab[:, h + 2:h + 3].astype(jnp.float32)
    return value, action, action_log_probs, rnn_hxs


if __name__ == "__main__":
    B, NUM_INPUTS, NUM_ACTIONS = 8, 16, 6

    key = jax.random.PRNGKey(0)
    x = jax.random.normal(key, (B, NUM_INPUTS), dtype=jnp.float32)
    rnn_hxs = jnp.zeros((B, 1), jnp.float32)   # recurrent_hidden_state_size == 1
    masks = jnp.ones((B, 1), jnp.float32)

    params, raw = make_params(NUM_INPUTS, HIDDEN, NUM_ACTIONS, seed=0)

    value, action, action_log_probs, rnn_out = policy_act(
        x, rnn_hxs, masks, params, num_actions=NUM_ACTIONS)
    jax.block_until_ready((value, action, action_log_probs, rnn_out))

    # ---- pure-JAX reference on the unfused weights (same bf16 operands) ----
    def ref_lin(h, w, bias):
        return jnp.dot(h.astype(jnp.bfloat16), jnp.asarray(w.T, jnp.bfloat16),
                       preferred_element_type=jnp.float32) + jnp.asarray(bias)

    ha = jnp.tanh(ref_lin(x, raw["wa1"], raw["ba1"]))
    ha = jnp.tanh(ref_lin(ha, raw["wa2"], raw["ba2"]))
    hc = jnp.tanh(ref_lin(x, raw["wc1"], raw["bc1"]))
    hc = jnp.tanh(ref_lin(hc, raw["wc2"], raw["bc2"]))
    v_ref = ref_lin(hc, raw["wv"], raw["bv"])
    logits_ref = ref_lin(ha, raw["wd"], raw["bd"])
    logp_ref = jax.nn.log_softmax(logits_ref, axis=-1)

    assert value.shape == (B, 1) and action.shape == (B, 1)
    assert action_log_probs.shape == (B, 1) and rnn_out.shape == (B, 1)
    np.testing.assert_allclose(np.asarray(value), np.asarray(v_ref),
                               rtol=2e-2, atol=2e-2)
    # kernel action must be a (near-)argmax of the reference logits
    gap = np.asarray(jnp.max(logits_ref, axis=-1, keepdims=True)
                     - jnp.take_along_axis(logits_ref, action, axis=-1))
    assert (gap <= 1e-3).all()
    np.testing.assert_allclose(
        np.asarray(action_log_probs),
        np.asarray(jnp.take_along_axis(logp_ref, action, axis=-1)),
        rtol=2e-2, atol=2e-2)

    print("KERNEL_OK")
</pallas_src>

<mosaic_0001>
module attributes {stable_mosaic.version = 11 : i64} {
  func.func @policy_fused_kernel(%arg0: i32, %arg1: memref<16x16xbf16, #tpu.memory_space<vmem>>, %arg2: memref<16x128xbf16, #tpu.memory_space<vmem>>, %arg3: memref<128x128xbf16, #tpu.memory_space<vmem>>, %arg4: memref<128x128xbf16, #tpu.memory_space<vmem>>, %arg5: memref<3x128xf32, #tpu.memory_space<vmem>>, %arg6: memref<16x128xbf16, #tpu.memory_space<vmem>>) attributes {dimension_semantics = [#tpu.dimension_semantics<parallel>], iteration_bounds = array<i64: 1>, scalar_prefetch = 0 : i64, scratch_operands = 0 : i64, tpu.core_type = #tpu.core_type<tc>, window_params = [{transform_indices = @transform_0, window_bounds = array<i64: 16, 16>}, {pipeline_mode = #tpu.pipeline_mode<synchronous>, transform_indices = @transform_1, window_bounds = array<i64: 16, 128>}, {pipeline_mode = #tpu.pipeline_mode<synchronous>, transform_indices = @transform_2, window_bounds = array<i64: 128, 128>}, {pipeline_mode = #tpu.pipeline_mode<synchronous>, transform_indices = @transform_3, window_bounds = array<i64: 128, 128>}, {pipeline_mode = #tpu.pipeline_mode<synchronous>, transform_indices = @transform_4, window_bounds = array<i64: 3, 128>}, {transform_indices = @transform_5, window_bounds = array<i64: 16, 128>}]} {
    %c0 = arith.constant 0 : index
    %c0_0 = arith.constant 0 : index
    %0 = vector.load %arg1[%c0, %c0_0] : memref<16x16xbf16, #tpu.memory_space<vmem>>, vector<16x16xbf16>
    %c0_1 = arith.constant 0 : index
    %c0_2 = arith.constant 0 : index
    %1 = vector.load %arg5[%c0_1, %c0_2] : memref<3x128xf32, #tpu.memory_space<vmem>>, vector<1x128xf32>
    %c1 = arith.constant 1 : index
    %c0_3 = arith.constant 0 : index
    %2 = vector.load %arg5[%c1, %c0_3] : memref<3x128xf32, #tpu.memory_space<vmem>>, vector<1x128xf32>
    %c2 = arith.constant 2 : index
    %c0_4 = arith.constant 0 : index
    %3 = vector.load %arg5[%c2, %c0_4] : memref<3x128xf32, #tpu.memory_space<vmem>>, vector<1x128xf32>
    %c0_5 = arith.constant 0 : index
    %c0_6 = arith.constant 0 : index
    %4 = vector.load %arg2[%c0_5, %c0_6] : memref<16x128xbf16, #tpu.memory_space<vmem>>, vector<16x128xbf16>
    %cst = arith.constant dense<0.000000e+00> : vector<16x128xf32>
    %5 = tpu.matmul %0, %4, %cst {dimension_numbers = #tpu.dot_dimension_numbers<[1], [0], [0], [1], [0, 0, 1, 1], [], []>} : vector<16x16xbf16>, vector<16x128xbf16>, vector<16x128xf32> -> vector<16x128xf32>
    %6 = vector.broadcast %1 : vector<1x128xf32> to vector<16x128xf32>
    %7 = arith.addf %5, %6 : vector<16x128xf32>
    %8 = math.tanh %7 : vector<16x128xf32>
    %9 = arith.truncf %8 : vector<16x128xf32> to vector<16x128xbf16>
    %c0_7 = arith.constant 0 : index
    %c0_8 = arith.constant 0 : index
    %10 = vector.load %arg3[%c0_7, %c0_8] : memref<128x128xbf16, #tpu.memory_space<vmem>>, vector<128x128xbf16>
    %cst_9 = arith.constant dense<0.000000e+00> : vector<16x128xf32>
    %11 = tpu.matmul %9, %10, %cst_9 {dimension_numbers = #tpu.dot_dimension_numbers<[1], [0], [0], [1], [0, 0, 1, 1], [], []>} : vector<16x128xbf16>, vector<128x128xbf16>, vector<16x128xf32> -> vector<16x128xf32>
    %12 = vector.broadcast %2 : vector<1x128xf32> to vector<16x128xf32>
    %13 = arith.addf %11, %12 : vector<16x128xf32>
    %14 = math.tanh %13 : vector<16x128xf32>
    %15 = arith.truncf %14 : vector<16x128xf32> to vector<16x128xbf16>
    %c0_10 = arith.constant 0 : index
    %c0_11 = arith.constant 0 : index
    %16 = vector.load %arg4[%c0_10, %c0_11] : memref<128x128xbf16, #tpu.memory_space<vmem>>, vector<128x128xbf16>
    %cst_12 = arith.constant dense<0.000000e+00> : vector<16x128xf32>
    %17 = tpu.matmul %15, %16, %cst_12 {dimension_numbers = #tpu.dot_dimension_numbers<[1], [0], [0], [1], [0, 0, 1, 1], [], []>} : vector<16x128xbf16>, vector<128x128xbf16>, vector<16x128xf32> -> vector<16x128xf32>
    %18 = vector.broadcast %3 : vector<1x128xf32> to vector<16x128xf32>
    %19 = arith.addf %17, %18 : vector<16x128xf32>
    %20 = tpu.iota {dimensions = array<i32: 1>} : vector<1x128xi32>
    %21 = arith.sitofp %20 : vector<1x128xi32> to vector<1x128xf32>
    %c6_i32 = arith.constant 6 : i32
    %22 = vector.broadcast %c6_i32 : i32 to vector<1x128xi32>
    %23 = arith.cmpi slt, %20, %22 : vector<1x128xi32>
    %cst_13 = arith.constant -1.000000e+30 : f32
    %24 = vector.shape_cast %23 : vector<1x128xi1> to vector<1x128xi1>
    %25 = vector.broadcast %24 : vector<1x128xi1> to vector<16x128xi1>
    %26 = vector.broadcast %cst_13 : f32 to vector<16x128xf32>
    %27 = arith.select %25, %19, %26 : vector<16x128xi1>, vector<16x128xf32>
    %cst_14 = arith.constant dense<0xFF800000> : vector<16xf32>
    %28 = vector.multi_reduction <maximumf>, %27, %cst_14 [1] : vector<16x128xf32> to vector<16xf32>
    %29 = vector.shape_cast %28 : vector<16xf32> to vector<16x1xf32>
    %30 = vector.broadcast %29 : vector<16x1xf32> to vector<16x128xf32>
    %31 = arith.subf %27, %30 : vector<16x128xf32>
    %32 = math.exp %31 : vector<16x128xf32>
    %cst_15 = arith.constant 0.000000e+00 : f32
    %33 = vector.shape_cast %23 : vector<1x128xi1> to vector<1x128xi1>
    %34 = vector.broadcast %33 : vector<1x128xi1> to vector<16x128xi1>
    %35 = vector.broadcast %cst_15 : f32 to vector<16x128xf32>
    %36 = arith.select %34, %32, %35 : vector<16x128xi1>, vector<16x128xf32>
    %cst_16 = arith.constant dense<0.000000e+00> : vector<16xf32>
    %37 = vector.multi_reduction <add>, %36, %cst_16 [1] : vector<16x128xf32> to vector<16xf32>
    %38 = vector.shape_cast %37 : vector<16xf32> to vector<16x1xf32>
    %39 = math.log %38 : vector<16x1xf32>
    %40 = vector.broadcast %29 : vector<16x1xf32> to vector<16x128xf32>
    %41 = arith.cmpf oge, %27, %40 : vector<16x128xf32>
    %cst_17 = arith.constant 1.280000e+02 : f32
    %42 = vector.shape_cast %21 : vector<1x128xf32> to vector<1x128xf32>
    %43 = vector.broadcast %42 : vector<1x128xf32> to vector<16x128xf32>
    %44 = vector.broadcast %cst_17 : f32 to vector<16x128xf32>
    %45 = arith.select %41, %43, %44 : vector<16x128xi1>, vector<16x128xf32>
    %cst_18 = arith.constant dense<0x7F800000> : vector<16xf32>
    %46 = vector.multi_reduction <minimumf>, %45, %cst_18 [1] : vector<16x128xf32> to vector<16xf32>
    %47 = vector.shape_cast %46 : vector<16xf32> to vector<16x1xf32>
    %cst_19 = arith.constant 0.000000e+00 : f32
    %48 = vector.broadcast %cst_19 : f32 to vector<16x1xf32>
    %49 = arith.subf %48, %39 : vector<16x1xf32>
    %50 = arith.mulf %36, %31 : vector<16x128xf32>
    %cst_20 = arith.constant dense<0.000000e+00> : vector<16xf32>
    %51 = vector.multi_reduction <add>, %50, %cst_20 [1] : vector<16x128xf32> to vector<16xf32>
    %52 = vector.shape_cast %51 : vector<16xf32> to vector<16x1xf32>
    %53 = tpu.reciprocal %38 {approx = true} : vector<16x1xf32> -> vector<16x1xf32>
    %54 = arith.mulf %52, %53 : vector<16x1xf32>
    %55 = arith.subf %39, %54 : vector<16x1xf32>
    %56 = vector.extract_strided_slice %19 {offsets = [0, 127], sizes = [16, 1], strides = [1, 1]} : vector<16x128xf32> to vector<16x1xf32>
    %c64_i32 = arith.constant 64 : i32
    %57 = vector.broadcast %c64_i32 : i32 to vector<1x128xi32>
    %58 = arith.cmpi slt, %20, %57 : vector<1x128xi32>
    %cst_21 = arith.constant 0.000000e+00 : f32
    %59 = vector.shape_cast %58 : vector<1x128xi1> to vector<1x128xi1>
    %60 = vector.broadcast %59 : vector<1x128xi1> to vector<16x128xi1>
    %61 = vector.broadcast %cst_21 : f32 to vector<16x128xf32>
    %62 = arith.select %60, %14, %61 : vector<16x128xi1>, vector<16x128xf32>
    %c64_i32_22 = arith.constant 64 : i32
    %63 = vector.broadcast %c64_i32_22 : i32 to vector<1x128xi32>
    %64 = arith.cmpi eq, %20, %63 : vector<1x128xi32>
    %65 = vector.shape_cast %64 : vector<1x128xi1> to vector<1x128xi1>
    %66 = vector.broadcast %65 : vector<1x128xi1> to vector<16x128xi1>
    %67 = vector.shape_cast %56 : vector<16x1xf32> to vector<16x1xf32>
    %68 = vector.broadcast %67 : vector<16x1xf32> to vector<16x128xf32>
    %69 = arith.select %66, %68, %62 : vector<16x128xi1>, vector<16x128xf32>
    %c65_i32 = arith.constant 65 : i32
    %70 = vector.broadcast %c65_i32 : i32 to vector<1x128xi32>
    %71 = arith.cmpi eq, %20, %70 : vector<1x128xi32>
    %72 = vector.shape_cast %71 : vector<1x128xi1> to vector<1x128xi1>
    %73 = vector.broadcast %72 : vector<1x128xi1> to vector<16x128xi1>
    %74 = vector.shape_cast %47 : vector<16x1xf32> to vector<16x1xf32>
    %75 = vector.broadcast %74 : vector<16x1xf32> to vector<16x128xf32>
    %76 = arith.select %73, %75, %69 : vector<16x128xi1>, vector<16x128xf32>
    %c66_i32 = arith.constant 66 : i32
    %77 = vector.broadcast %c66_i32 : i32 to vector<1x128xi32>
    %78 = arith.cmpi eq, %20, %77 : vector<1x128xi32>
    %79 = vector.shape_cast %78 : vector<1x128xi1> to vector<1x128xi1>
    %80 = vector.broadcast %79 : vector<1x128xi1> to vector<16x128xi1>
    %81 = vector.shape_cast %49 : vector<16x1xf32> to vector<16x1xf32>
    %82 = vector.broadcast %81 : vector<16x1xf32> to vector<16x128xf32>
    %83 = arith.select %80, %82, %76 : vector<16x128xi1>, vector<16x128xf32>
    %c67_i32 = arith.constant 67 : i32
    %84 = vector.broadcast %c67_i32 : i32 to vector<1x128xi32>
    %85 = arith.cmpi eq, %20, %84 : vector<1x128xi32>
    %86 = vector.shape_cast %85 : vector<1x128xi1> to vector<1x128xi1>
    %87 = vector.broadcast %86 : vector<1x128xi1> to vector<16x128xi1>
    %88 = vector.shape_cast %55 : vector<16x1xf32> to vector<16x1xf32>
    %89 = vector.broadcast %88 : vector<16x1xf32> to vector<16x128xf32>
    %90 = arith.select %87, %89, %83 : vector<16x128xi1>, vector<16x128xf32>
    %91 = arith.truncf %90 : vector<16x128xf32> to vector<16x128xbf16>
    %c0_23 = arith.constant 0 : index
    %c0_24 = arith.constant 0 : index
    %92 = vector.load %arg6[%c0_23, %c0_24] : memref<16x128xbf16, #tpu.memory_space<vmem>>, vector<16x128xbf16>
    tpu.vector_store %arg6[%c0_23, %c0_24], %91 {strides = array<i32>} : memref<16x128xbf16, #tpu.memory_space<vmem>>, vector<16x128xbf16>,
    return
  }
  func.func @transform_0(%arg0: i32) -> (i32, i32) {
    %c0_i32 = arith.constant 0 : i32
    %c0_i32_0 = arith.constant 0 : i32
    return %arg0, %c0_i32 : i32, i32
  }
  func.func @transform_1(%arg0: i32) -> (i32, i32) {
    %c0_i32 = arith.constant 0 : i32
    %c0_i32_0 = arith.constant 0 : i32
    %c0_i32_1 = arith.constant 0 : i32
    return %c0_i32, %c0_i32_0 : i32, i32
  }
  func.func @transform_2(%arg0: i32) -> (i32, i32) {
    %c0_i32 = arith.constant 0 : i32
    %c0_i32_0 = arith.constant 0 : i32
    %c0_i32_1 = arith.constant 0 : i32
    return %c0_i32, %c0_i32_0 : i32, i32
  }
  func.func @transform_3(%arg0: i32) -> (i32, i32) {
    %c0_i32 = arith.constant 0 : i32
    %c0_i32_0 = arith.constant 0 : i32
    %c0_i32_1 = arith.constant 0 : i32
    return %c0_i32, %c0_i32_0 : i32, i32
  }
  func.func @transform_4(%arg0: i32) -> (i32, i32) {
    %c0_i32 = arith.constant 0 : i32
    %c0_i32_0 = arith.constant 0 : i32
    %c0_i32_1 = arith.constant 0 : i32
    return %c0_i32, %c0_i32_0 : i32, i32
  }
  func.func @transform_5(%arg0: i32) -> (i32, i32) {
    %c0_i32 = arith.constant 0 : i32
    %c0_i32_0 = arith.constant 0 : i32
    return %arg0, %c0_i32 : i32, i32
  }
}

</mosaic_0001>

<bundles_post_ra>
// kernel: policy_act.1
= control target key start
LH: loop header
LB: loop body
LE: loop exit
PB: predicated region body
PF: predicated region fallthrough
CT: control target
= control target key end

     0   :  { %10 = vsyncpa [#allocation3], 0  ;;  %s769_s0 = inlined_call_operand.vmem [shape: bf16[16,16], index: 0, kind: input, shape index: {}]   ;;  %s770_s1 = inlined_call_operand.vmem [shape: bf16[16,128], index: 1, kind: input, shape index: {}]   ;;  %s771_s2 = inlined_call_operand.hbm [shape: bf16[128,128], index: 2, kind: input, shape index: {}]   ;;  %s772_s3 = inlined_call_operand.hbm [shape: bf16[128,128], index: 3, kind: input, shape index: {}]   ;;  %s773_s4 = inlined_call_operand.vmem [shape: f32[3,128], index: 4, kind: input, shape index: {}]   ;;  %s774_s5 = inlined_call_operand.vmem [shape: bf16[16,128], index: 5, kind: output, shape index: {}]  }
   0x1   :  { %11 = vsyncpa [#allocation5], 0  ;;  %s637_s18 = smov [#allocation2]   ;;  %s589_s22 = scalar_lea.hbm %s771_s2, 1024 }
   0x2   :  { %s21_s19 = sshll.u32 %s637_s18, 4  ;;  %p590_p0 = scmp.ne.s32.totalorder %s771_s2, %s589_s22  ;;  %s22_s19 = int_to_ptr.vmem [resolvable:$true] %s21_s19 }
   0x3   :  { %p593_p1 = scmp.lt.u32.totalorder %s589_s22, %s771_s2 }
   0x5   :  { %p595_p2 = pnand %p593_p1, %p590_p0 }
   0x7   :  { %598 = shalt.err (!%p595_p2)
}
   0x8   :  { %s599_s27 = scalar_lea.vmem %s22_s19, 1024  ;;  %p604_p4 = scmp.lt.s32.totalorder %s22_s19, %s22_s19 }
   0x9   :  { %p600_p3 = scmp.ne.s32.totalorder %s22_s19, %s599_s27  ;;  %p605_p5 = scmp.lt.s32.totalorder %s599_s27, %s599_s27 }
   0xb   :  { %p606_p6 = por %p605_p5, %p604_p4 }
   0xd   :  { %p607_p7 = pnand %p606_p6, %p600_p3 }
   0xf   :  { %610 = shalt.err (!%p607_p7)
}
  0x10   :  { %s638_s28 = smov 64   ;;  %s639_s29 = smov 4  }
  0x11   :  { %27 = dma.hbm_to_vmem [thread:$0]  %s771_s2, 1024, %s22_s19, [#allocation3], %s638_s28, %s638_s28, %s639_s29  }
  0x12   :  { %s640_s7 = smov [#allocation4]   ;;  %s611_s11 = scalar_lea.hbm %s772_s3, 1024 }
  0x13   :  { %s33_s8 = sshll.u32 %s640_s7, 4  ;;  %p612_p8 = scmp.ne.s32.totalorder %s772_s3, %s611_s11  ;;  %s34_s8 = int_to_ptr.vmem [resolvable:$true] %s33_s8 }
  0x14   :  { %p615_p9 = scmp.lt.u32.totalorder %s611_s11, %s772_s3 }
  0x16   :  { %p617_p10 = pnand %p615_p9, %p612_p8 }
  0x18   :  { %620 = shalt.err (!%p617_p10)
}
  0x19   :  { %s621_s16 = scalar_lea.vmem %s34_s8, 1024  ;;  %p626_p12 = scmp.lt.s32.totalorder %s34_s8, %s34_s8 }
  0x1a   :  { %p622_p11 = scmp.ne.s32.totalorder %s34_s8, %s621_s16  ;;  %p627_p13 = scmp.lt.s32.totalorder %s621_s16, %s621_s16 }
  0x1c   :  { %p628_p0 = por %p627_p13, %p626_p12 }
  0x1e   :  { %p629_p1 = pnand %p628_p0, %p622_p11 }
  0x20   :  { %632 = shalt.err (!%p629_p1)
}
  0x21   :  { %39 = dma.hbm_to_vmem [thread:$0]  %s772_s3, 1024, %s34_s8, [#allocation5], %s638_s28, %s638_s28, %s639_s29  }
  0x22   :  { %633 = dma.done.wait [#allocation3], 1024  }
  0x23   :  { %634 = vsyncadd [#allocation3], 4294966272 }
  0x24   :  { %635 = dma.done.wait [#allocation5], 1024  }
  0x25   :  { %636 = vsyncadd [#allocation5], 4294966272  ;;  %v641_v0 = vmov 0.0   ;;  %vm642_vm0 = vmmov 0   ;;  %v551_v1 = vld [vmem:[%s770_s1] sm:$0xff]   ;;  %vm71_vm1 = vcmask 130048   ;;  %v340_v39 = vlaneseq }
  0x26   :  { %492 = vmatprep.subr.bf16.mxu0 %v641_v0  ;;  %494 = vmatprep.mubr.msk.bf16.mxu0 %vm642_vm0, %v641_v0  ;;  %v552_v2 = vld [vmem:[%s769_s0] sm:$0xff]   ;;  %v554_v4 = vld [vmem:[#allocation2 + $0x8] sm:$0xff]   ;;  %v555_v5 = vld [vmem:[#allocation2 + $0x10] sm:$0xff]   ;;  %v643_v51 = vmov 127  }
  0x27   :  { %498 = vmatprep.subr.bf16.mxu1 %v641_v0  ;;  %514 = vmatprep.mubr.msk.bf16.mxu1 %vm642_vm0, %v641_v0  ;;  %v553_v3 = vld [vmem:[#allocation2] sm:$0xff]   ;;  %v556_v6 = vld [vmem:[#allocation2 + $0x18] sm:$0xff]   ;;  %v558_v8 = vld [vmem:[#allocation2 + $0x28] sm:$0xff]   ;;  %v739_v41 = vand.u32 127, %v340_v39 }
  0x28   :  { %493 = vmatpush3.bf16.msra.mxu0 %v551_v1  ;;  %499 = vmatpush3.bf16.msra.mxu1 %v553_v3  ;;  %v557_v7 = vld [vmem:[#allocation2 + $0x20] sm:$0xff]   ;;  %v559_v9 = vld [vmem:[#allocation2 + $0x30] sm:$0xff]   ;;  %v560_v10 = vld [vmem:[#allocation2 + $0x38] sm:$0xff]  }
  0x29   :  { %518 = vmatprep.subr.bf16.mxu0 %v641_v0  ;;  %500 = vmatprep.subr.bf16.mxu1 %v641_v0  ;;  %v561_v11 = vld [vmem:[#allocation4] sm:$0xff]   ;;  %v562_v12 = vld [vmem:[#allocation4 + $0x8] sm:$0xff]   ;;  %v563_v13 = vld [vmem:[#allocation4 + $0x10] sm:$0xff]   ;;  %vm343_vm2 = vcmp.lt.s32.totalorder %v739_v41, 6  ;;  %v342_v52 = vcvt.s32.f32 %v739_v41  ;;  %vm390_vm5 = vcmp.lt.s32.totalorder %v739_v41, 64  ;;  %vm395_vm6 = vcmp.eq.s32.totalorder %v739_v41, 64 }
  0x2a   :  { %v564_v14 = vld [vmem:[#allocation4 + $0x18] sm:$0xff]   ;;  %v441_v15 = vld [vmem:[%s773_s4] ss:$0 sm:$0xff]  ;;  %v566_v26 = vld [vmem:[#allocation4 + $0x28] sm:$0xff]   ;;  %545 = vset.pattern.permute.xlu0 %v643_v51  ;;  %vm410_vm7 = vcmp.eq.s32.totalorder %v739_v41, 65  ;;  %vm415_vm8 = vcmp.eq.s32.totalorder %v739_v41, 66 }
  0x2b   :  { %495 = vmatmul.mubr.msk.bf16.vlgmr.msra.gmra.mrb[0].mxu0 %vm71_vm1, %v552_v2  ;;  %v565_v25 = vld [vmem:[#allocation4 + $0x20] sm:$0xff]   ;;  %v567_v27 = vld [vmem:[#allocation4 + $0x30] sm:$0xff]   ;;  %v568_v28 = vld [vmem:[#allocation4 + $0x38] sm:$0xff]   ;;  %vm420_vm9 = vcmp.eq.s32.totalorder %v739_v41, 67 }
  0x2c   :  { %534 = vmatprep.mubr.msk.bf16.mxu0 %vm642_vm0, %v641_v0  ;;  %501 = vmatpush3.bf16.msra.mxu1 %v554_v4  ;;  %v445_v29 = vld [vmem:[%s773_s4 + $0x1] ss:$0 sm:$0xff]  ;;  %v454_v40 = vld [vmem:[%s773_s4 + $0x2] ss:$0 sm:$0xff] }
  0x2d   :  { %502 = vmatprep.subr.bf16.mxu1 %v641_v0  ;;  %519 = vmatpush3.bf16.msra.mxu0 %v561_v11 }
  0x2e   :  { %520 = vmatprep.subr.bf16.mxu0 %v641_v0 }
  0x30   :  { %503 = vmatpush3.bf16.msra.mxu1 %v555_v5 }
  0x31   :  { %504 = vmatprep.subr.bf16.mxu1 %v641_v0  ;;  %521 = vmatpush3.bf16.msra.mxu0 %v562_v12 }
  0x32   :  { %522 = vmatprep.subr.bf16.mxu0 %v641_v0 }
  0x34   :  { %505 = vmatpush3.bf16.msra.mxu1 %v556_v6 }
  0x35   :  { %506 = vmatprep.subr.bf16.mxu1 %v641_v0  ;;  %523 = vmatpush3.bf16.msra.mxu0 %v563_v13 }
  0x36   :  { %524 = vmatprep.subr.bf16.mxu0 %v641_v0 }
  0x38   :  { %507 = vmatpush3.bf16.msra.mxu1 %v557_v7 }
  0x39   :  { %508 = vmatprep.subr.bf16.mxu1 %v641_v0  ;;  %525 = vmatpush3.bf16.msra.mxu0 %v564_v14 }
  0x3a   :  { %526 = vmatprep.subr.bf16.mxu0 %v641_v0 }
  0x3c   :  { %509 = vmatpush3.bf16.msra.mxu1 %v558_v8 }
  0x3d   :  { %510 = vmatprep.subr.bf16.mxu1 %v641_v0  ;;  %527 = vmatpush3.bf16.msra.mxu0 %v565_v25 }
  0x3e   :  { %528 = vmatprep.subr.bf16.mxu0 %v641_v0 }
  0x40   :  { %511 = vmatpush3.bf16.msra.mxu1 %v559_v9 }
  0x41   :  { %512 = vmatprep.subr.bf16.mxu1 %v641_v0  ;;  %529 = vmatpush3.bf16.msra.mxu0 %v566_v26 }
  0x42   :  { %530 = vmatprep.subr.bf16.mxu0 %v641_v0 }
  0x44   :  { %513 = vmatpush3.bf16.msra.mxu1 %v560_v10 }
  0x45   :  { %531 = vmatpush3.bf16.msra.mxu0 %v567_v27 }
  0x46   :  { %532 = vmatprep.subr.bf16.mxu0 %v641_v0 }
  0x49   :  { %533 = vmatpush3.bf16.msra.mxu0 %v568_v28 }
  0xfe   :  { %v109_v16 = vpop.f32.mrb[0].mxu0 }
  0xff   :  { %v110_v17 = vadd.f32 %v441_v15, %v109_v16  ;;  %v496_v18 = vpop.f32.mrb[1].mxu0 }
 0x100   :  { %v112_v19 = vpop.f32.mrb[2].mxu0 }
 0x101   :  { %v113_v20 = vadd.f32 %v441_v15, %v112_v19  ;;  %v497_v21 = vpop.f32.mrb[3].mxu0  ;;  %569 = vtanh.f32 %v110_v17 }
 0x103   :  { %571 = vtanh.f32 %v113_v20 }
 0x10b   :  { %v570_v22 = vpop.eup %569 }
 0x10d   :  { %v572_v23 = vpop.eup %571 }
 0x10e   :  { %v118_v24 = vpack.c.bf16 %v572_v23, %v570_v22 }
 0x110   :  { %515 = vmatmul.mubr.bf16.vlgmr.msra.gmra.mrb[0].mxu1 %v118_v24 }
 0x1e3   :  { %v221_v30 = vpop.f32.mrb[0].mxu1 }
 0x1e4   :  { %v222_v31 = vadd.f32 %v445_v29, %v221_v30  ;;  %v516_v32 = vpop.f32.mrb[1].mxu1 }
 0x1e5   :  { %v224_v33 = vpop.f32.mrb[2].mxu1 }
 0x1e6   :  { %v225_v34 = vadd.f32 %v445_v29, %v224_v33  ;;  %v517_v35 = vpop.f32.mrb[3].mxu1  ;;  %573 = vtanh.f32 %v222_v31 }
 0x1e8   :  { %575 = vtanh.f32 %v225_v34 }
 0x1f0   :  { %v730_v36 = vpop.eup %573 }
 0x1f1   :  { %v393_v13 = vsel %vm390_vm5, %v730_v36, 0.0 }
 0x1f2   :  { %v732_v37 = vpop.eup %575 }
 0x1f3   :  { %v230_v38 = vpack.c.bf16 %v732_v37, %v730_v36  ;;  %v394_v19 = vsel %vm390_vm5, %v732_v37, 0.0 }
 0x1f5   :  { %535 = vmatmul.mubr.bf16.vlgmr.msra.gmra.mrb[4].mxu0 %v230_v38 }
 0x2c8   :  { %v333_v42 = vpop.f32.mrb[4].mxu0 }
 0x2c9   :  { %v334_v43 = vadd.f32 %v454_v40, %v333_v42  ;;  %v536_v44 = vpop.f32.mrb[5].mxu0 }
 0x2ca   :  { %v336_v45 = vpop.f32.mrb[6].mxu0 }
 0x2cb   :  { %v337_v46 = vadd.f32 %v454_v40, %v336_v45  ;;  %v537_v47 = vpop.f32.mrb[7].mxu0  ;;  %v346_v48 = vsel %vm343_vm2, %v334_v43, -1e+30 }
 0x2cc   :  { %348 = vmax.xlane.f32.xlu0 %v346_v48 }
 0x2cd   :  { %v546_v49 = vpack.i.bf16 %v337_v46, %v334_v43  ;;  %v347_v50 = vsel %vm343_vm2, %v337_v46, -1e+30 }
 0x2d0   :  { %350 = vmax.xlane.f32.xlu0 %v347_v50 }
 0x359   :  { %v349_v53 = vpop.xlane.xlu0 %348 }
 0x35a   :  { %v352_v54 = vsub.f32 %v346_v48, %v349_v53  ;;  %vm368_vm3 = vcmp.ge.f32.partialorder %v346_v48, %v349_v53 }
 0x35b   :  { %v370_v55 = vsel %vm368_vm3, %v342_v52, 128.0 }
 0x35c   :  { %v354_v56 = vmul.f32 1.442695, %v352_v54  ;;  %372 = vmin.xlane.f32.xlu0 %v370_v55 }
 0x35d   :  { %v351_v57 = vpop.xlane.xlu0 %350 }
 0x35e   :  { %577 = vpow2.f32 %v354_v56  ;;  %v353_v58 = vsub.f32 %v347_v50, %v351_v57  ;;  %vm369_vm4 = vcmp.ge.f32.partialorder %v347_v50, %v351_v57 }
 0x35f   :  { %v371_v2 = vsel %vm369_vm4, %v342_v52, 128.0 }
 0x360   :  { %v356_v59 = vmul.f32 1.442695, %v353_v58 }
 0x362   :  { %579 = vpow2.f32 %v356_v59 }
 0x368   :  { %v578_v60 = vpop.eup %577 }
 0x369   :  { %v358_v61 = vsel %vm343_vm2, %v578_v60, 0.0 }
 0x36a   :  { %360 = vadd.xlane.f32.xlu1 %v358_v61  ;;  %v378_v62 = vmul.f32 %v358_v61, %v352_v54 }
 0x36c   :  { %v580_v63 = vpop.eup %579  ;;  %380 = vadd.xlane.f32.xlu0 %v378_v62 }
 0x36d   :  { %v359_v0 = vsel %vm343_vm2, %v580_v63, 0.0 }
 0x36e   :  { %362 = vadd.xlane.f32.xlu1 %v359_v0  ;;  %v379_v1 = vmul.f32 %v359_v0, %v353_v58 }
 0x372   :  { %382 = vadd.xlane.f32.xlu1 %v379_v1 }
 0x376   :  { %374 = vmin.xlane.f32.xlu1 %v371_v2 }
 0x382   :  { %547 = vperm.xlu0 %545, %v546_v49  }
 0x3e9   :  { %v373_v4 = vpop.xlane.xlu0 %372 }
 0x3f7   :  { %v361_v3 = vpop.xlane.xlu1 %360 }
 0x3f8   :  { %581 = vlog2.f32 %v361_v3 }
 0x3f9   :  { %583 = vrcp.f32 %v361_v3  ;;  %v381_v6 = vpop.xlane.xlu0 %380 }
 0x3fb   :  { %v363_v5 = vpop.xlane.xlu1 %362 }
 0x3fc   :  { %585 = vlog2.f32 %v363_v5 }
 0x3fd   :  { %587 = vrcp.f32 %v363_v5 }
 0x3ff   :  { %v383_v7 = vpop.xlane.xlu1 %382 }
 0x401   :  { %v548_v8 = vpop.permute.xlu0 %547 }
 0x402   :  { %v582_v9 = vpop.eup %581  ;;  %v549_v10 = vunpack.i.l.bf16 %v548_v8  ;;  %v550_v14 = vunpack.i.h.bf16 %v548_v8 }
 0x403   :  { %v584_v11 = vpop.eup %583  ;;  %v365_v12 = vmul.f32 0.6931472, %v582_v9  ;;  %v375_v23 = vpop.xlane.xlu1 %374 }
 0x404   :  { %v386_v15 = vmul.f32 %v584_v11, %v381_v6  ;;  %v408_v16 = vsel %vm395_vm6, %v549_v10, %v393_v13  ;;  %v409_v24 = vsel %vm395_vm6, %v550_v14, %v394_v19 }
 0x405   :  { %v376_v17 = vsub.f32 0.0, %v365_v12  ;;  %v413_v20 = vsel %vm410_vm7, %v373_v4, %v408_v16  ;;  %v414_v30 = vsel %vm410_vm7, %v375_v23, %v409_v24 }
 0x406   :  { %v586_v18 = vpop.eup %585  ;;  %v388_v25 = vsub.f32 %v365_v12, %v386_v15 }
 0x407   :  { %v588_v21 = vpop.eup %587  ;;  %v367_v22 = vmul.f32 0.6931472, %v586_v18  ;;  %v418_v28 = vsel %vm415_vm8, %v376_v17, %v413_v20 }
 0x408   :  { %v387_v26 = vmul.f32 %v588_v21, %v383_v7  ;;  %v423_v32 = vsel %vm420_vm9, %v388_v25, %v418_v28 }
 0x409   :  { %v377_v27 = vsub.f32 0.0, %v367_v22 }
 0x40a   :  { %v389_v29 = vsub.f32 %v367_v22, %v387_v26 }
 0x40b   :  { %v419_v31 = vsel %vm415_vm8, %v377_v27, %v414_v30 }
 0x40c   :  { %v424_v33 = vsel %vm420_vm9, %v389_v29, %v419_v31 }
 0x40d   :  { %v470_v34 = vpack.c.bf16 %v424_v33, %v423_v32 }
 0x40f   :  { %471 = vst [vmem:[%s774_s5] sm:$0xff] %v470_v34  }
 0x410   :  { %439 = vsyncpa [#allocation3], 1 }
 0x411   :  { %440 = vsyncpa [#allocation5], 1 }

</bundles_post_ra>
